<compile_context>
chip_gen: v7x
topology: tpu7x:2x2x1
jax: 0.10.0
libtpu: 0.0.40
codegen_flags: <defaults>
</compile_context>

<pallas_src>
import jax
import jax.numpy as jnp
from jax.experimental import pallas as pl
from jax.experimental.pallas import tpu as pltpu


def ebm_energy_kernel(x_ref, w1_ref, b1_ref, w2row_ref, b2_ref, e_ref):
    # Layer 1: one MXU matmul (bf16 operands, f32 accumulation), then bias+ReLU
    # on the VPU in f32.  b1_ref already contains the folded y_hat @ W1y term.
    h = jnp.dot(x_ref[...], w1_ref[...],
                preferred_element_type=jnp.float32)          # [tm, H] f32
    h = jnp.maximum(h + b1_ref[...], 0.0)                    # bias + ReLU

    # Layer 2 (output width 1): VPU multiply + XLU lane reduction against W2
    # passed as a [1, H] row -- no MXU pass/drain for a single output column.
    # b2 is a scalar read from SMEM.
    e = jnp.sum(h * w2row_ref[...], axis=-1, keepdims=True) + b2_ref[0]  # [tm, 1]

    e_ref[...] = e.astype(e_ref.dtype)


def ebm_inferencer_forward(x, y_hat, w1x, w1y, b1, w2, b2, *, tm=256):
    """Pallas forward pass of EBMInferencer: energy = ebm(X, y_hat)."""
    B, Dx = x.shape
    H = w1x.shape[-1]

    # ---- wrapper-side prep (tiny XLA ops, once per call) -------------------
    # Fold the shared y_hat row into the first-layer bias (review item #1).
    b1_eff = (y_hat.reshape(1, -1).astype(jnp.float32)
              @ w1y.astype(jnp.float32)
              + b1.reshape(1, H).astype(jnp.float32))        # [1, H] f32
    w2_row = w2.reshape(1, H).astype(jnp.float32)            # [1, H] f32
    b2_s = b2.reshape((1,)).astype(jnp.float32)              # scalar -> SMEM

    # bf16 MXU operands (v6e/v7x win; accumulation stays f32 in-kernel).
    x_bf = x.astype(jnp.bfloat16)
    w1_bf = w1x.astype(jnp.bfloat16)

    # ---- batch tiling -------------------------------------------------------
    tm = max(8, (min(tm, B) // 8) * 8)           # sublane-aligned tile
    n_tiles = pl.cdiv(B, tm)
    b_pad = n_tiles * tm
    if b_pad != B:                               # pad ragged batch; rows discarded
        x_bf = jnp.pad(x_bf, ((0, b_pad - B), (0, 0)))
    grid = (n_tiles,)

    out = pl.pallas_call(
        ebm_energy_kernel,
        out_shape=jax.ShapeDtypeStruct((b_pad, 1), jnp.float32),
        grid=grid,
        in_specs=[
            # X streams tile-by-tile (double-buffered by the Pallas pipeline).
            pl.BlockSpec((tm, Dx), lambda i: (i, 0)),
            # Constant index maps -> fetched once, VMEM-resident across steps.
            pl.BlockSpec((Dx, H), lambda i: (0, 0)),          # W1x (bf16)
            pl.BlockSpec((1, H), lambda i: (0, 0)),           # b1_eff (f32)
            pl.BlockSpec((1, H), lambda i: (0, 0)),           # W2 as a row (f32)
            pl.BlockSpec(memory_space=pltpu.MemorySpace.SMEM),  # b2 scalar
        ],
        out_specs=pl.BlockSpec((tm, 1), lambda i: (i, 0)),
        compiler_params=pltpu.CompilerParams(
            # Independent batch tiles -> shard across v7x's two TensorCores.
            dimension_semantics=("parallel",),
            # Explicit budget: 2*tm*Dx*2B (x bufs) + Dx*H*2B (W1) + small rows
            # is << 32 MiB; fits v7x's 64 MiB physical VMEM with huge headroom.
            vmem_limit_bytes=32 * 1024 * 1024,
        ),
    )(x_bf, w1_bf, b1_eff, w2_row, b2_s)

    return out[:B]


def reference_forward(x, y_hat, w1x, w1y, b1, w2, b2):
    h = jnp.maximum(x @ w1x + y_hat @ w1y + b1, 0.0)
    return h @ w2 + b2


if __name__ == "__main__":
    # Lane/sublane-aligned shapes: Dx = 64 (full-dim lane block), H = 128,
    # B = 512 with tm = 256 -> grid of 2 parallel steps (pipelining + 2-TC).
    B, Dx, Dy, H = 512, 64, 64, 128

    key = jax.random.PRNGKey(0)
    kx, ky, k1, k2, k3, k4 = jax.random.split(key, 6)

    # Input X and the learnable initial_tensor y_hat (nn.Parameter).
    x = jax.random.normal(kx, (B, Dx), dtype=jnp.float32)
    y_hat = jax.random.normal(ky, (1, Dy), dtype=jnp.float32)

    # Deterministically initialized synthetic EBM parameters.
    w1x = jax.random.normal(k1, (Dx, H), dtype=jnp.float32) * 0.1
    w1y = jax.random.normal(k2, (Dy, H), dtype=jnp.float32) * 0.1
    b1 = jax.random.normal(k3, (1, H), dtype=jnp.float32) * 0.01
    w2 = jax.random.normal(k4, (H, 1), dtype=jnp.float32) * 0.1
    b2 = jnp.zeros((1, 1), dtype=jnp.float32)

    energy = ebm_inferencer_forward(x, y_hat, w1x, w1y, b1, w2, b2, tm=256)
    energy = jax.block_until_ready(energy)

    ref = reference_forward(x, y_hat, w1x, w1y, b1, w2, b2)
    assert energy.shape == (B, 1), energy.shape
    # Tolerance loosened vs the pure-f32 reference because the first-layer
    # matmul uses bf16 MXU operands (f32 accumulation).
    max_err = jnp.max(jnp.abs(energy - ref))
    assert jnp.allclose(energy, ref, atol=5e-2, rtol=5e-2), (
        f"mismatch: max err {max_err}"
    )
    print("KERNEL_OK")
</pallas_src>

<mosaic_0001>
module attributes {stable_mosaic.version = 11 : i64} {
  func.func @ebm_energy_kernel(%arg0: i32, %arg1: memref<256x64xbf16, #tpu.memory_space<vmem>>, %arg2: memref<64x128xbf16, #tpu.memory_space<vmem>>, %arg3: memref<1x128xf32, #tpu.memory_space<vmem>>, %arg4: memref<1x128xf32, #tpu.memory_space<vmem>>, %arg5: memref<1xf32, #tpu.memory_space<smem>>, %arg6: memref<256x1xf32, #tpu.memory_space<vmem>>) attributes {dimension_semantics = [#tpu.dimension_semantics<parallel>], iteration_bounds = array<i64: 2>, scalar_prefetch = 0 : i64, scratch_operands = 0 : i64, tpu.core_type = #tpu.core_type<tc>, window_params = [{transform_indices = @transform_0, window_bounds = array<i64: 256, 64>}, {pipeline_mode = #tpu.pipeline_mode<synchronous>, transform_indices = @transform_1, window_bounds = array<i64: 64, 128>}, {pipeline_mode = #tpu.pipeline_mode<synchronous>, transform_indices = @transform_2, window_bounds = array<i64: 1, 128>}, {pipeline_mode = #tpu.pipeline_mode<synchronous>, transform_indices = @transform_3, window_bounds = array<i64: 1, 128>}, {transform_indices = @transform_4, window_bounds = array<i64: 1>}, {transform_indices = @transform_5, window_bounds = array<i64: 256, 1>}]} {
    %c0 = arith.constant 0 : index
    %c0_0 = arith.constant 0 : index
    %0 = vector.load %arg1[%c0, %c0_0] : memref<256x64xbf16, #tpu.memory_space<vmem>>, vector<256x64xbf16>
    %c0_1 = arith.constant 0 : index
    %c0_2 = arith.constant 0 : index
    %1 = vector.load %arg2[%c0_1, %c0_2] : memref<64x128xbf16, #tpu.memory_space<vmem>>, vector<64x128xbf16>
    %cst = arith.constant dense<0.000000e+00> : vector<256x128xf32>
    %2 = tpu.matmul %0, %1, %cst {dimension_numbers = #tpu.dot_dimension_numbers<[1], [0], [0], [1], [0, 0, 1, 1], [], []>} : vector<256x64xbf16>, vector<64x128xbf16>, vector<256x128xf32> -> vector<256x128xf32>
    %c0_3 = arith.constant 0 : index
    %c0_4 = arith.constant 0 : index
    %3 = vector.load %arg3[%c0_3, %c0_4] : memref<1x128xf32, #tpu.memory_space<vmem>>, vector<1x128xf32>
    %4 = vector.broadcast %3 : vector<1x128xf32> to vector<256x128xf32>
    %5 = arith.addf %2, %4 : vector<256x128xf32>
    %cst_5 = arith.constant 0.000000e+00 : f32
    %6 = vector.broadcast %cst_5 : f32 to vector<256x128xf32>
    %7 = arith.maximumf %5, %6 : vector<256x128xf32>
    %c0_6 = arith.constant 0 : index
    %c0_7 = arith.constant 0 : index
    %8 = vector.load %arg4[%c0_6, %c0_7] : memref<1x128xf32, #tpu.memory_space<vmem>>, vector<1x128xf32>
    %9 = vector.broadcast %8 : vector<1x128xf32> to vector<256x128xf32>
    %10 = arith.mulf %7, %9 : vector<256x128xf32>
    %cst_8 = arith.constant dense<0.000000e+00> : vector<256xf32>
    %11 = vector.multi_reduction <add>, %10, %cst_8 [1] : vector<256x128xf32> to vector<256xf32>
    %12 = vector.shape_cast %11 : vector<256xf32> to vector<256x1xf32>
    %c0_9 = arith.constant 0 : index
    %13 = memref.load %arg5[%c0_9] : memref<1xf32, #tpu.memory_space<smem>>
    %14 = vector.broadcast %13 : f32 to vector<256x1xf32>
    %15 = arith.addf %12, %14 : vector<256x1xf32>
    %c0_10 = arith.constant 0 : index
    %c0_11 = arith.constant 0 : index
    %16 = vector.load %arg6[%c0_10, %c0_11] : memref<256x1xf32, #tpu.memory_space<vmem>>, vector<256x1xf32>
    tpu.vector_store %arg6[%c0_10, %c0_11], %15 {strides = array<i32>} : memref<256x1xf32, #tpu.memory_space<vmem>>, vector<256x1xf32>,
    return
  }
  func.func @transform_0(%arg0: i32) -> (i32, i32) {
    %c0_i32 = arith.constant 0 : i32
    %c0_i32_0 = arith.constant 0 : i32
    return %arg0, %c0_i32 : i32, i32
  }
  func.func @transform_1(%arg0: i32) -> (i32, i32) {
    %c0_i32 = arith.constant 0 : i32
    %c0_i32_0 = arith.constant 0 : i32
    %c0_i32_1 = arith.constant 0 : i32
    return %c0_i32, %c0_i32_0 : i32, i32
  }
  func.func @transform_2(%arg0: i32) -> (i32, i32) {
    %c0_i32 = arith.constant 0 : i32
    %c0_i32_0 = arith.constant 0 : i32
    %c0_i32_1 = arith.constant 0 : i32
    return %c0_i32, %c0_i32_0 : i32, i32
  }
  func.func @transform_3(%arg0: i32) -> (i32, i32) {
    %c0_i32 = arith.constant 0 : i32
    %c0_i32_0 = arith.constant 0 : i32
    %c0_i32_1 = arith.constant 0 : i32
    return %c0_i32, %c0_i32_0 : i32, i32
  }
  func.func @transform_4(%arg0: i32) -> i32 {
    %c0_i32 = arith.constant 0 : i32
    %c0_i32_0 = arith.constant 0 : i32
    return %c0_i32 : i32
  }
  func.func @transform_5(%arg0: i32) -> (i32, i32) {
    %c0_i32 = arith.constant 0 : i32
    %c0_i32_0 = arith.constant 0 : i32
    return %arg0, %c0_i32 : i32, i32
  }
}

</mosaic_0001>

<bundles_post_ra>
// kernel: tpu_custom_call.1
= control target key start
LH: loop header
LB: loop body
LE: loop exit
PB: predicated region body
PF: predicated region fallthrough
CT: control target
= control target key end

     0   :  { %s1035_s20 = smov 0   ;;  %s1279_s0 = inlined_call_operand.vmem [shape: bf16[512,64], index: 0, kind: input, shape index: {}]   ;;  %s1280_s1 = inlined_call_operand.vmem [shape: bf16[64,128], index: 1, kind: input, shape index: {}]   ;;  %s1281_s2 = inlined_call_operand.vmem [shape: f32[1,128], index: 2, kind: input, shape index: {}]   ;;  %s1282_s3 = inlined_call_operand.vmem [shape: f32[1,128], index: 3, kind: input, shape index: {}]   ;;  %s1283_s4 = inlined_call_operand.<no memory space> [shape: f32[1], index: 4, kind: input, shape index: {}]   ;;  %s1284_s5 = inlined_call_operand.vmem [shape: f32[512,1], index: 5, kind: output, shape index: {}]  }
   0x1   :  { %10 = sst [smem:[#allocation2]] %s1283_s4 }
   0x2 LB: > { %s849_s21 = sadd.s32 4294967295, %s1000_s20   ;;  %p853_p0 = scmp.ge.s32.totalorder %s1000_s20, 1  ;;  %s1000_s20 = sphi %s1035_s20, %s16_s20  }
   0x3   : > { %p189_p1 = scmp.lt.s32.totalorder %s1000_s20, 3 }
   0x5   : > { %p190_p2 = pnand %p853_p0, %p189_p1 }
   0x6   : > { %v974_v0 = vld [vmem:[%s1280_s1] sm:$0xff] (!%p190_p2)   ;;  %s854_s4 = sshll.u32 (!%p190_p2), %s849_s21, 5  ;;  %v975_v1 = vld [vmem:[%s1280_s1 + $0x8] sm:$0xff] (!%p190_p2)   ;;  %v976_v2 = vld [vmem:[%s1280_s1 + $0x10] sm:$0xff] (!%p190_p2)   ;;  %vm381_vm0 = vcmask (!%p190_p2), 523264   ;;  %s726_s13 = sld [smem:[#allocation2]] (!%p190_p2) }
   0x7   : > { %193 = sbr.rel (%p190_p2) target bundleno = 446 (0x1be), region = 40  ;;  %p218_p3 = scmp.lt.s32.totalorder (!%p190_p2), %s854_s4, 63  ;;  %918 = vmatprep.subr.bf16.mxu0 (!%p190_p2), %v974_v0  ;;  %958 = vmatprep.subr.bf16.mxu1 (!%p190_p2), %v974_v0  ;;  %v977_v3 = vld [vmem:[%s1280_s1 + $0x18] sm:$0xff] (!%p190_p2)   ;;  %v1098_v20 = vld [vmem:[%s1281_s2] ss:$0 sm:$0xff] (!%p190_p2)  ;;  %vm760_vm1 = vcmask (!%p190_p2), 7168  }
   0x8   : > { %919 = vmatpush3.bf16.msra.mxu0 (!%p190_p2), %v974_v0  ;;  %962 = vmatpush3.bf16.msra.mxu1 (!%p190_p2), %v974_v0  ;;  %v1106_v30 = vld [vmem:[%s1282_s3] ss:$0 sm:$0xff] (!%p190_p2) }
   0x9   : > { %920 = vmatprep.subr.bf16.mxu0 (!%p190_p2), %v975_v1  ;;  %959 = vmatprep.subr.bf16.mxu1 (!%p190_p2), %v975_v1 }
   0xc   : > { %921 = vmatpush3.bf16.msra.mxu0 (!%p190_p2), %v975_v1  ;;  %963 = vmatpush3.bf16.msra.mxu1 (!%p190_p2), %v975_v1 }
   0xd   : > { %922 = vmatprep.subr.bf16.mxu0 (!%p190_p2), %v976_v2  ;;  %960 = vmatprep.subr.bf16.mxu1 (!%p190_p2), %v976_v2 }
   0xe   : > { %s1286_s4 = smov (!%p218_p3, %s854_s4), 63 }
   0xf   : > { %s855_s28 = sshll.u32 %s1286_s4, 2  ;;  %s857_s14 = sshll.u32 %s1286_s4, 3 }
  0x10   : > { %s1061_s8 = scalar_lea.vmem %s1279_s0, %s855_s28  ;;  %923 = vmatpush3.bf16.msra.mxu0 %v976_v2  ;;  %964 = vmatpush3.bf16.msra.mxu1 %v976_v2  ;;  %s1178_s17 = scalar_lea.vmem %s1284_s5, %s857_s14 }
  0x11   : > { %v978_v4 = vld [vmem:[%s1061_s8] sm:$0xff]   ;;  %924 = vmatprep.subr.bf16.mxu0 %v977_v3  ;;  %961 = vmatprep.subr.bf16.mxu1 %v977_v3  ;;  %v980_v6 = vld [vmem:[%s1061_s8 + $0x8] sm:$0xff]   ;;  %v982_v8 = vld [vmem:[%s1061_s8 + $0x10] sm:$0xff]  }
  0x12   : > { %v979_v5 = vld [vmem:[%s1061_s8 + $0x40] sm:$0xff]   ;;  %926 = vmatprep.mubr.msk.bf16.mxu0 %vm381_vm0, %v978_v4  ;;  %v981_v7 = vld [vmem:[%s1061_s8 + $0x48] sm:$0xff]   ;;  %v984_v9 = vld [vmem:[%s1061_s8 + $0x50] sm:$0xff]  }
  0x13   : > { %942 = vmatprep.mubr.msk.bf16.mxu1 %vm381_vm0, %v979_v5  ;;  %v983_v10 = vld [vmem:[%s1061_s8 + $0x18] sm:$0xff]   ;;  %v986_v12 = vld [vmem:[%s1061_s8 + $0x20] sm:$0xff]   ;;  %v987_v14 = vld [vmem:[%s1061_s8 + $0x28] sm:$0xff]  }
  0x14   : > { %925 = vmatpush3.bf16.msra.mxu0 %v977_v3  ;;  %965 = vmatpush3.bf16.msra.mxu1 %v977_v3  ;;  %v985_v11 = vld [vmem:[%s1061_s8 + $0x58] sm:$0xff]   ;;  %v988_v13 = vld [vmem:[%s1061_s8 + $0x60] sm:$0xff]   ;;  %v989_v15 = vld [vmem:[%s1061_s8 + $0x68] sm:$0xff]  }
  0x15   : > { %v990_v16 = vld [vmem:[%s1061_s8 + $0x30] sm:$0xff]   ;;  %v991_v18 = vld [vmem:[%s1061_s8 + $0x38] sm:$0xff]  }
  0x16   : > { %v992_v17 = vld [vmem:[%s1061_s8 + $0x70] sm:$0xff]   ;;  %v993_v19 = vld [vmem:[%s1061_s8 + $0x78] sm:$0xff]  }
  0x17   : > { %927 = vmatmul.mubr.msk.bf16.vlgmr.msra.gmra.mrb[0].mxu0 %vm381_vm0, %v980_v6  ;;  %943 = vmatmul.mubr.msk.bf16.vlgmr.msra.gmra.mrb[0].mxu1 %vm381_vm0, %v981_v7 }
  0x18   : > { %930 = vmatprep.mubr.msk.bf16.mxu0 %vm381_vm0, %v982_v8  ;;  %946 = vmatprep.mubr.msk.bf16.mxu1 %vm381_vm0, %v984_v9 }
  0x1f   : > { %931 = vmatmul.mubr.msk.bf16.gmra.mrb[4].mxu0 %vm381_vm0, %v983_v10  ;;  %947 = vmatmul.mubr.msk.bf16.gmra.mrb[4].mxu1 %vm381_vm0, %v985_v11 }
  0x20   : > { %934 = vmatprep.mubr.msk.bf16.mxu0 %vm381_vm0, %v986_v12  ;;  %950 = vmatprep.mubr.msk.bf16.mxu1 %vm381_vm0, %v988_v13 }
  0x27   : > { %935 = vmatmul.mubr.msk.bf16.gmra.mrb[8].mxu0 %vm381_vm0, %v987_v14  ;;  %951 = vmatmul.mubr.msk.bf16.gmra.mrb[8].mxu1 %vm381_vm0, %v989_v15 }
  0x28   : > { %938 = vmatprep.mubr.msk.bf16.mxu0 %vm381_vm0, %v990_v16  ;;  %954 = vmatprep.mubr.msk.bf16.mxu1 %vm381_vm0, %v992_v17 }
  0x2f   : > { %939 = vmatmul.mubr.msk.bf16.gmra.mrb[12].mxu0 %vm381_vm0, %v991_v18  ;;  %955 = vmatmul.mubr.msk.bf16.gmra.mrb[12].mxu1 %vm381_vm0, %v993_v19 }
  0xea   : > { %v928_v21 = vpop.f32.mrb[0].mxu0  ;;  %v944_v22 = vpop.f32.mrb[0].mxu1 }
  0xeb   : > { %v473_v23 = vadd.f32 %v928_v21, %v1098_v20  ;;  %v537_v24 = vadd.f32 %v944_v22, %v1098_v20  ;;  %v464_v25 = vpop.f32.mrb[1].mxu0  ;;  %v528_v26 = vpop.f32.mrb[1].mxu1 }
  0xec   : > { %v465_v27 = vadd.f32 %v1098_v20, %v464_v25  ;;  %v929_v28 = vpop.f32.mrb[2].mxu0  ;;  %v945_v29 = vpop.f32.mrb[2].mxu1  ;;  %v529_v36 = vadd.f32 %v1098_v20, %v528_v26 }
  0xed   : > { %v593_v31 = vmax.f32 %v473_v23, 0.0  ;;  %v609_v32 = vmax.f32 %v537_v24, 0.0  ;;  %v476_v33 = vadd.f32 %v929_v28, %v1098_v20  ;;  %v467_v34 = vpop.f32.mrb[3].mxu0  ;;  %v531_v35 = vpop.f32.mrb[3].mxu1  ;;  %v540_v37 = vadd.f32 %v945_v29, %v1098_v20 }
  0xee   : > { %v591_v38 = vmax.f32 %v465_v27, 0.0  ;;  %v468_v42 = vadd.f32 %v1098_v20, %v467_v34  ;;  %v532_v43 = vadd.f32 %v1098_v20, %v531_v35  ;;  %v607_v46 = vmax.f32 %v529_v36, 0.0 }
  0xef   : > { %v594_v39 = vmax.f32 %v476_v33, 0.0  ;;  %v648_v40 = vmul.f32 %v1106_v30, %v609_v32  ;;  %v632_v41 = vmul.f32 %v1106_v30, %v593_v31  ;;  %v610_v47 = vmax.f32 %v540_v37, 0.0 }
  0xf0   : > { %v630_v49 = vmul.f32 %v1106_v30, %v591_v38  ;;  %v592_v56 = vmax.f32 %v468_v42, 0.0  ;;  %v608_v57 = vmax.f32 %v532_v43, 0.0  ;;  %v646_v61 = vmul.f32 %v1106_v30, %v607_v46 }
  0xf1   : > { %698 = vadd.xlane.f32.xlu0 %v648_v40  ;;  %666 = vadd.xlane.f32.xlu1 %v632_v41  ;;  %v633_v48 = vmul.f32 %v1106_v30, %v594_v39  ;;  %v649_v60 = vmul.f32 %v1106_v30, %v610_v47 }
  0xf2   : > { %v932_v44 = vpop.f32.mrb[4].mxu0  ;;  %v948_v45 = vpop.f32.mrb[4].mxu1  ;;  %v647_v63 = vmul.f32 %v1106_v30, %v608_v57  ;;  %v631_v5 = vmul.f32 %v1106_v30, %v592_v56 }
  0xf3   : > { %v480_v50 = vpop.f32.mrb[5].mxu0  ;;  %v544_v51 = vpop.f32.mrb[5].mxu1  ;;  %v489_v58 = vadd.f32 %v932_v44, %v1098_v20  ;;  %v553_v62 = vadd.f32 %v948_v45, %v1098_v20 }
  0xf4   : > { %v933_v52 = vpop.f32.mrb[6].mxu0  ;;  %v949_v53 = vpop.f32.mrb[6].mxu1  ;;  %v481_v12 = vadd.f32 %v1098_v20, %v480_v50  ;;  %v545_v18 = vadd.f32 %v1098_v20, %v544_v51 }
  0xf5   : > { %668 = vadd.xlane.f32.xlu1 %v633_v48  ;;  %662 = vadd.xlane.f32.xlu0 %v630_v49  ;;  %v483_v54 = vpop.f32.mrb[7].mxu0  ;;  %v547_v55 = vpop.f32.mrb[7].mxu1  ;;  %v492_v59 = vadd.f32 %v933_v52, %v1098_v20  ;;  %v597_v2 = vmax.f32 %v489_v58, 0.0  ;;  %v556_v4 = vadd.f32 %v949_v53, %v1098_v20  ;;  %v613_v13 = vmax.f32 %v553_v62, 0.0 }
  0xf6   : > { %v484_v14 = vadd.f32 %v1098_v20, %v483_v54  ;;  %v548_v19 = vadd.f32 %v1098_v20, %v547_v55  ;;  %v595_v23 = vmax.f32 %v481_v12, 0.0  ;;  %v611_v34 = vmax.f32 %v545_v18, 0.0 }
  0xf7   : > { %v598_v3 = vmax.f32 %v492_v59, 0.0  ;;  %v614_v15 = vmax.f32 %v556_v4, 0.0  ;;  %v636_v17 = vmul.f32 %v1106_v30, %v597_v2  ;;  %v652_v26 = vmul.f32 %v1106_v30, %v613_v13 }
  0xf8   : > { %v596_v24 = vmax.f32 %v484_v14, 0.0  ;;  %v612_v35 = vmax.f32 %v548_v19, 0.0  ;;  %v634_v39 = vmul.f32 %v1106_v30, %v595_v23  ;;  %v650_v41 = vmul.f32 %v1106_v30, %v611_v34 }
  0xf9   : > { %700 = vadd.xlane.f32.xlu1 %v649_v60  ;;  %694 = vadd.xlane.f32.xlu0 %v646_v61  ;;  %v637_v16 = vmul.f32 %v1106_v30, %v598_v3  ;;  %v653_v25 = vmul.f32 %v1106_v30, %v614_v15 }
  0xfa   : > { %v936_v0 = vpop.f32.mrb[8].mxu0  ;;  %v952_v1 = vpop.f32.mrb[8].mxu1  ;;  %v635_v38 = vmul.f32 %v1106_v30, %v596_v24  ;;  %v651_v45 = vmul.f32 %v1106_v30, %v612_v35  ;;  %v1173_v24 = vstv %s726_s13 }
  0xfb   : > { %v496_v6 = vpop.f32.mrb[9].mxu0  ;;  %v560_v7 = vpop.f32.mrb[9].mxu1  ;;  %v505_v36 = vadd.f32 %v936_v0, %v1098_v20  ;;  %v569_v40 = vadd.f32 %v952_v1, %v1098_v20 }
  0xfc   : > { %v937_v8 = vpop.f32.mrb[10].mxu0  ;;  %v953_v9 = vpop.f32.mrb[10].mxu1  ;;  %v497_v46 = vadd.f32 %v1098_v20, %v496_v6  ;;  %v561_v52 = vadd.f32 %v1098_v20, %v560_v7 }
  0xfd   : > { %696 = vadd.xlane.f32.xlu1 %v647_v63  ;;  %664 = vadd.xlane.f32.xlu0 %v631_v5  ;;  %v499_v10 = vpop.f32.mrb[11].mxu0  ;;  %v563_v11 = vpop.f32.mrb[11].mxu1  ;;  %v508_v37 = vadd.f32 %v937_v8, %v1098_v20  ;;  %v601_v42 = vmax.f32 %v505_v36, 0.0  ;;  %v572_v44 = vadd.f32 %v953_v9, %v1098_v20  ;;  %v617_v47 = vmax.f32 %v569_v40, 0.0 }
  0xfe   : > { %v500_v48 = vadd.f32 %v1098_v20, %v499_v10  ;;  %v564_v53 = vadd.f32 %v1098_v20, %v563_v11  ;;  %v599_v54 = vmax.f32 %v497_v46, 0.0  ;;  %v615_v58 = vmax.f32 %v561_v52, 0.0 }
  0xff   : > { %v602_v43 = vmax.f32 %v508_v37, 0.0  ;;  %v618_v49 = vmax.f32 %v572_v44, 0.0  ;;  %v640_v51 = vmul.f32 %v1106_v30, %v601_v42  ;;  %v656_v57 = vmul.f32 %v1106_v30, %v617_v47 }
 0x100   : > { %v600_v55 = vmax.f32 %v500_v48, 0.0  ;;  %v616_v59 = vmax.f32 %v564_v53, 0.0  ;;  %v638_v63 = vmul.f32 %v1106_v30, %v599_v54  ;;  %v654_v1 = vmul.f32 %v1106_v30, %v615_v58 }
 0x101   : > { %676 = vadd.xlane.f32.xlu1 %v637_v16  ;;  %674 = vadd.xlane.f32.xlu0 %v636_v17  ;;  %v641_v50 = vmul.f32 %v1106_v30, %v602_v43  ;;  %v657_v56 = vmul.f32 %v1106_v30, %v618_v49 }
 0x102   : > { %v940_v21 = vpop.f32.mrb[12].mxu0  ;;  %v1131_v22 = vpop.f32.mrb[12].mxu1  ;;  %v639_v62 = vmul.f32 %v1106_v30, %v600_v55  ;;  %v655_v5 = vmul.f32 %v1106_v30, %v616_v59 }
 0x103   : > { %v512_v27 = vpop.f32.mrb[13].mxu0  ;;  %v576_v28 = vpop.f32.mrb[13].mxu1  ;;  %v521_v60 = vadd.f32 %v940_v21, %v1098_v20  ;;  %v585_v12 = vadd.f32 %v1131_v22, %v1098_v20 }
 0x104   : > { %v941_v29 = vpop.f32.mrb[14].mxu0  ;;  %v957_v31 = vpop.f32.mrb[14].mxu1  ;;  %v513_v0 = vadd.f32 %v1098_v20, %v512_v27  ;;  %v577_v7 = vadd.f32 %v1098_v20, %v576_v28 }
 0x105   : > { %708 = vadd.xlane.f32.xlu1 %v653_v25  ;;  %706 = vadd.xlane.f32.xlu0 %v652_v26  ;;  %v515_v32 = vpop.f32.mrb[15].mxu0  ;;  %v579_v33 = vpop.f32.mrb[15].mxu1  ;;  %v524_v61 = vadd.f32 %v941_v29, %v1098_v20  ;;  %v605_v2 = vmax.f32 %v521_v60, 0.0  ;;  %v588_v13 = vadd.f32 %v957_v31, %v1098_v20  ;;  %v621_v18 = vmax.f32 %v585_v12, 0.0 }
 0x106   : > { %v516_v4 = vadd.f32 %v1098_v20, %v515_v32  ;;  %v603_v6 = vmax.f32 %v513_v0, 0.0  ;;  %v580_v9 = vadd.f32 %v1098_v20, %v579_v33  ;;  %v619_v14 = vmax.f32 %v577_v7, 0.0 }
 0x107   : > { %v606_v3 = vmax.f32 %v524_v61, 0.0  ;;  %v644_v11 = vmul.f32 %v1106_v30, %v605_v2  ;;  %v622_v19 = vmax.f32 %v588_v13, 0.0  ;;  %v660_v20 = vmul.f32 %v1106_v30, %v621_v18 }
 0x108   : > { %v604_v8 = vmax.f32 %v516_v4, 0.0  ;;  %v620_v15 = vmax.f32 %v580_v9, 0.0  ;;  %v642_v17 = vmul.f32 %v1106_v30, %v603_v6  ;;  %v658_v23 = vmul.f32 %v1106_v30, %v619_v14 }
 0x109   : > { %672 = vadd.xlane.f32.xlu1 %v635_v38  ;;  %670 = vadd.xlane.f32.xlu0 %v634_v39  ;;  %v645_v10 = vmul.f32 %v1106_v30, %v606_v3  ;;  %v661_v22 = vmul.f32 %v1106_v30, %v622_v19 }
 0x10a   : > { %v643_v16 = vmul.f32 %v1106_v30, %v604_v8  ;;  %v659_v21 = vmul.f32 %v1106_v30, %v620_v15 }
 0x10d   : > { %704 = vadd.xlane.f32.xlu1 %v651_v45  ;;  %702 = vadd.xlane.f32.xlu0 %v650_v41 }
 0x111   : > { %684 = vadd.xlane.f32.xlu1 %v641_v50  ;;  %682 = vadd.xlane.f32.xlu0 %v640_v51 }
 0x115   : > { %716 = vadd.xlane.f32.xlu1 %v657_v56  ;;  %714 = vadd.xlane.f32.xlu0 %v656_v57 }
 0x119   : > { %680 = vadd.xlane.f32.xlu1 %v639_v62  ;;  %678 = vadd.xlane.f32.xlu0 %v638_v63 }
 0x11d   : > { %712 = vadd.xlane.f32.xlu1 %v655_v5  ;;  %710 = vadd.xlane.f32.xlu0 %v654_v1 }
 0x121   : > { %692 = vadd.xlane.f32.xlu1 %v645_v10  ;;  %690 = vadd.xlane.f32.xlu0 %v644_v11 }
 0x125   : > { %688 = vadd.xlane.f32.xlu1 %v643_v16  ;;  %686 = vadd.xlane.f32.xlu0 %v642_v17 }
 0x129   : > { %720 = vadd.xlane.f32.xlu1 %v659_v21  ;;  %718 = vadd.xlane.f32.xlu0 %v658_v23 }
 0x12d   : > { %724 = vadd.xlane.f32.xlu1 %v661_v22  ;;  %722 = vadd.xlane.f32.xlu0 %v660_v20 }
 0x17e   : > { %v699_v25 = vpop.xlane.xlu0 %698  ;;  %v667_v26 = vpop.xlane.xlu1 %666 }
 0x17f   : > { %v746_v30 = vadd.f32 %v1173_v24, %v699_v25  ;;  %v730_v27 = vadd.f32 %v1173_v24, %v667_v26 }
 0x181   : > { %779 = vst.msk [vmem:[%s1178_s17 + $0x90] sm:$0xff] %vm760_vm1, %v746_v30  ;;  %763 = vst.msk [vmem:[%s1178_s17 + $0x10] sm:$0xff] %vm760_vm1, %v730_v27 }
 0x182   : > { %v669_v28 = vpop.xlane.xlu1 %668  ;;  %v663_v29 = vpop.xlane.xlu0 %662 }
 0x183   : > { %v731_v31 = vadd.f32 %v1173_v24, %v669_v28  ;;  %v728_v32 = vadd.f32 %v1173_v24, %v663_v29 }
 0x185   : > { %764 = vst.msk [vmem:[%s1178_s17 + $0x18] sm:$0xff] %vm760_vm1, %v731_v31  ;;  %761 = vst.msk [vmem:[%s1178_s17] sm:$0xff] %vm760_vm1, %v728_v32 }
 0x186   : > { %v701_v33 = vpop.xlane.xlu1 %700  ;;  %v695_v34 = vpop.xlane.xlu0 %694 }
 0x187   : > { %v747_v35 = vadd.f32 %v1173_v24, %v701_v33  ;;  %v744_v36 = vadd.f32 %v1173_v24, %v695_v34 }
 0x189   : > { %780 = vst.msk [vmem:[%s1178_s17 + $0x98] sm:$0xff] %vm760_vm1, %v747_v35  ;;  %777 = vst.msk [vmem:[%s1178_s17 + $0x80] sm:$0xff] %vm760_vm1, %v744_v36 }
 0x18a   : > { %v697_v37 = vpop.xlane.xlu1 %696  ;;  %v665_v38 = vpop.xlane.xlu0 %664 }
 0x18b   : > { %v745_v39 = vadd.f32 %v1173_v24, %v697_v37  ;;  %v729_v40 = vadd.f32 %v1173_v24, %v665_v38 }
 0x18d   : > { %778 = vst.msk [vmem:[%s1178_s17 + $0x88] sm:$0xff] %vm760_vm1, %v745_v39  ;;  %762 = vst.msk [vmem:[%s1178_s17 + $0x8] sm:$0xff] %vm760_vm1, %v729_v40 }
 0x18e   : > { %v677_v41 = vpop.xlane.xlu1 %676  ;;  %v675_v42 = vpop.xlane.xlu0 %674 }
 0x18f   : > { %v735_v43 = vadd.f32 %v1173_v24, %v677_v41  ;;  %v734_v44 = vadd.f32 %v1173_v24, %v675_v42 }
 0x191   : > { %768 = vst.msk [vmem:[%s1178_s17 + $0x38] sm:$0xff] %vm760_vm1, %v735_v43  ;;  %767 = vst.msk [vmem:[%s1178_s17 + $0x30] sm:$0xff] %vm760_vm1, %v734_v44 }
 0x192   : > { %v709_v45 = vpop.xlane.xlu1 %708  ;;  %v707_v46 = vpop.xlane.xlu0 %706 }
 0x193   : > { %v751_v47 = vadd.f32 %v1173_v24, %v709_v45  ;;  %v750_v48 = vadd.f32 %v1173_v24, %v707_v46 }
 0x195   : > { %784 = vst.msk [vmem:[%s1178_s17 + $0xb8] sm:$0xff] %vm760_vm1, %v751_v47  ;;  %783 = vst.msk [vmem:[%s1178_s17 + $0xb0] sm:$0xff] %vm760_vm1, %v750_v48 }
 0x196   : > { %v673_v49 = vpop.xlane.xlu1 %672  ;;  %v671_v50 = vpop.xlane.xlu0 %670 }
 0x197   : > { %v733_v51 = vadd.f32 %v1173_v24, %v673_v49  ;;  %v732_v52 = vadd.f32 %v1173_v24, %v671_v50 }
 0x199   : > { %766 = vst.msk [vmem:[%s1178_s17 + $0x28] sm:$0xff] %vm760_vm1, %v733_v51  ;;  %765 = vst.msk [vmem:[%s1178_s17 + $0x20] sm:$0xff] %vm760_vm1, %v732_v52 }
 0x19a   : > { %v705_v53 = vpop.xlane.xlu1 %704  ;;  %v703_v54 = vpop.xlane.xlu0 %702 }
 0x19b   : > { %v749_v55 = vadd.f32 %v1173_v24, %v705_v53  ;;  %v748_v56 = vadd.f32 %v1173_v24, %v703_v54 }
 0x19d   : > { %782 = vst.msk [vmem:[%s1178_s17 + $0xa8] sm:$0xff] %vm760_vm1, %v749_v55  ;;  %781 = vst.msk [vmem:[%s1178_s17 + $0xa0] sm:$0xff] %vm760_vm1, %v748_v56 }
 0x19e   : > { %v685_v57 = vpop.xlane.xlu1 %684  ;;  %v683_v58 = vpop.xlane.xlu0 %682 }
 0x19f   : > { %v739_v59 = vadd.f32 %v1173_v24, %v685_v57  ;;  %v738_v60 = vadd.f32 %v1173_v24, %v683_v58 }
 0x1a1   : > { %772 = vst.msk [vmem:[%s1178_s17 + $0x58] sm:$0xff] %vm760_vm1, %v739_v59  ;;  %771 = vst.msk [vmem:[%s1178_s17 + $0x50] sm:$0xff] %vm760_vm1, %v738_v60 }
 0x1a2   : > { %v717_v61 = vpop.xlane.xlu1 %716  ;;  %v715_v62 = vpop.xlane.xlu0 %714 }
 0x1a3   : > { %v755_v63 = vadd.f32 %v1173_v24, %v717_v61  ;;  %v754_v0 = vadd.f32 %v1173_v24, %v715_v62 }
 0x1a5   : > { %788 = vst.msk [vmem:[%s1178_s17 + $0xd8] sm:$0xff] %vm760_vm1, %v755_v63  ;;  %787 = vst.msk [vmem:[%s1178_s17 + $0xd0] sm:$0xff] %vm760_vm1, %v754_v0 }
 0x1a6   : > { %v681_v1 = vpop.xlane.xlu1 %680  ;;  %v679_v2 = vpop.xlane.xlu0 %678 }
 0x1a7   : > { %v737_v3 = vadd.f32 %v1173_v24, %v681_v1  ;;  %v736_v4 = vadd.f32 %v1173_v24, %v679_v2 }
 0x1a9   : > { %770 = vst.msk [vmem:[%s1178_s17 + $0x48] sm:$0xff] %vm760_vm1, %v737_v3  ;;  %769 = vst.msk [vmem:[%s1178_s17 + $0x40] sm:$0xff] %vm760_vm1, %v736_v4 }
 0x1aa   : > { %v713_v5 = vpop.xlane.xlu1 %712  ;;  %v711_v6 = vpop.xlane.xlu0 %710 }
 0x1ab   : > { %v753_v7 = vadd.f32 %v1173_v24, %v713_v5  ;;  %v752_v8 = vadd.f32 %v1173_v24, %v711_v6 }
 0x1ad   : > { %786 = vst.msk [vmem:[%s1178_s17 + $0xc8] sm:$0xff] %vm760_vm1, %v753_v7  ;;  %785 = vst.msk [vmem:[%s1178_s17 + $0xc0] sm:$0xff] %vm760_vm1, %v752_v8 }
 0x1ae   : > { %v693_v9 = vpop.xlane.xlu1 %692  ;;  %v691_v10 = vpop.xlane.xlu0 %690 }
 0x1af   : > { %v743_v11 = vadd.f32 %v1173_v24, %v693_v9  ;;  %v742_v12 = vadd.f32 %v1173_v24, %v691_v10 }
 0x1b1   : > { %776 = vst.msk [vmem:[%s1178_s17 + $0x78] sm:$0xff] %vm760_vm1, %v743_v11  ;;  %775 = vst.msk [vmem:[%s1178_s17 + $0x70] sm:$0xff] %vm760_vm1, %v742_v12 }
 0x1b2   : > { %v689_v13 = vpop.xlane.xlu1 %688  ;;  %v687_v14 = vpop.xlane.xlu0 %686 }
 0x1b3   : > { %v741_v15 = vadd.f32 %v1173_v24, %v689_v13  ;;  %v740_v16 = vadd.f32 %v1173_v24, %v687_v14 }
 0x1b5   : > { %774 = vst.msk [vmem:[%s1178_s17 + $0x68] sm:$0xff] %vm760_vm1, %v741_v15  ;;  %773 = vst.msk [vmem:[%s1178_s17 + $0x60] sm:$0xff] %vm760_vm1, %v740_v16 }
 0x1b6   : > { %v721_v17 = vpop.xlane.xlu1 %720  ;;  %v719_v18 = vpop.xlane.xlu0 %718 }
 0x1b7   : > { %v757_v19 = vadd.f32 %v1173_v24, %v721_v17  ;;  %v756_v21 = vadd.f32 %v1173_v24, %v719_v18 }
 0x1b9   : > { %790 = vst.msk [vmem:[%s1178_s17 + $0xe8] sm:$0xff] %vm760_vm1, %v757_v19  ;;  %789 = vst.msk [vmem:[%s1178_s17 + $0xe0] sm:$0xff] %vm760_vm1, %v756_v21 }
 0x1ba   : > { %v725_v23 = vpop.xlane.xlu1 %724  ;;  %v723_v22 = vpop.xlane.xlu0 %722 }
 0x1bb   : > { %v759_v20 = vadd.f32 %v1173_v24, %v725_v23  ;;  %v758_v25 = vadd.f32 %v1173_v24, %v723_v22 }
 0x1bd   : > { %792 = vst.msk [vmem:[%s1178_s17 + $0xf8] sm:$0xff] %vm760_vm1, %v759_v20  ;;  %791 = vst.msk [vmem:[%s1178_s17 + $0xf0] sm:$0xff] %vm760_vm1, %v758_v25 }
 0x1be PF: > { %s16_s20 = sadd.s32 1, %s1000_s20  }
 0x1bf   : > { %p13_p4 = scmp.ge.s32.totalorder %s16_s20, 4  }
 0x1c1   :  { %15 = sbr.rel (!%p13_p4) target bundleno = 2 (0x2), region = 70 }

</bundles_post_ra>
